<compile_context>
chip_gen: v7x
topology: tpu7x:2x2x1
jax: 0.10.0
libtpu: 0.0.40
codegen_flags: <defaults>
</compile_context>

<pallas_src>
import jax
import jax.numpy as jnp
from jax.experimental import pallas as pl
from jax.experimental.pallas import tpu as pltpu

D = 128          # protein feature dim
HID = 128        # experts_hidden


def _pick_bm(B):
    """Pick the batch tile: whole batch for small B; big tiles (and >=2 grid
    steps so v7x can shard across its two TensorCores) for large B."""
    if B <= 1024:
        return B
    for bm in (1024, 512, 256, 128, 64, 32, 16, 8):
        if B % bm == 0:
            return bm
    return B


def _ple_protein_kernel(x_ref, w1c_ref, b1c_ref, w2st_ref, b2st_ref, out_ref):
    x = x_ref[...]                                             # (BM, 128)

    # --- Fused first layer + gate: one (BM,128) x (128,384) MXU pass -------
    #   cols [0:128)   -> share-expert hidden (pre-ReLU)
    #   cols [128:256) -> task-0 expert hidden (pre-ReLU)
    #   cols [256:258) -> task-0 gate logits (NO softmax, matches PyTorch)
    h = jnp.dot(x, w1c_ref[...], preferred_element_type=jnp.float32) + b1c_ref[...]
    h_s = jnp.maximum(h[:, 0:D], 0.0)                          # (BM, 128)
    h_t = jnp.maximum(h[:, D:2 * D], 0.0)                      # (BM, 128)
    g0 = h[:, 2 * D:2 * D + 1]                                 # (BM, 1) share weight
    g1 = h[:, 2 * D + 1:2 * D + 2]                             # (BM, 1) task weight

    # --- Fused second layer + gating blend: one (BM,256) x (256,128) pass --
    #   concat(g0*relu(h_s), g1*relu(h_t)) @ [W2_s; W2_t] + g0*b2_s + g1*b2_t
    #   == g0*(relu(h_s)@W2_s + b2_s) + g1*(relu(h_t)@W2_t + b2_t)
    #   == g0*y_s + g1*y_t
    h_cat = jnp.concatenate([g0 * h_s, g1 * h_t], axis=-1)     # (BM, 256)
    out = jnp.dot(h_cat, w2st_ref[...], preferred_element_type=jnp.float32)
    out = out + g0 * b2st_ref[0:1, :] + g1 * b2st_ref[1:2, :]
    out_ref[...] = out


def ple_protein_forward(ec_x, params):
    """ec_x: (B, 1, 128) float32.  Returns [task0_out (B,1,128), None]."""
    B = ec_x.shape[0]
    x = ec_x.reshape(B, D)

    bm = _pick_bm(B)
    grid = (pl.cdiv(B, bm),)

    const = lambda i: (0, 0)   # weights stay resident across grid steps

    out = pl.pallas_call(
        _ple_protein_kernel,
        out_shape=jax.ShapeDtypeStruct((B, D), jnp.float32),
        grid=grid,
        in_specs=[
            pl.BlockSpec((bm, D), lambda i: (i, 0)),            # x
            pl.BlockSpec((D, 3 * D), const),                    # W1cat  (128, 384)
            pl.BlockSpec((1, 3 * D), const),                    # b1cat  (1, 384)
            pl.BlockSpec((2 * D, D), const),                    # W2stack (256, 128)
            pl.BlockSpec((2, D), const),                        # b2stack (2, 128)
        ],
        out_specs=pl.BlockSpec((bm, D), lambda i: (i, 0)),
        compiler_params=pltpu.CompilerParams(
            dimension_semantics=("parallel",)),
    )(x,
      params["w1_cat"], params["b1_cat"],
      params["w2_stack"], params["b2_stack"])

    task0_out = out.reshape(B, 1, D)
    return [task0_out, None]


def init_params(key):
    ks = jax.random.split(key, 10)
    scale = 0.05

    def lin(k, fan_in, fan_out):
        return scale * jax.random.normal(k, (fan_in, fan_out), jnp.float32)

    # Share expert
    w1_s = lin(ks[0], D, HID)
    b1_s = scale * jax.random.normal(ks[1], (1, HID), jnp.float32)
    w2_s = lin(ks[2], HID, D)
    b2_s = scale * jax.random.normal(ks[3], (1, D), jnp.float32)
    # Task-0 expert
    w1_t = lin(ks[4], D, HID)
    b1_t = scale * jax.random.normal(ks[5], (1, HID), jnp.float32)
    w2_t = lin(ks[6], HID, D)
    b2_t = scale * jax.random.normal(ks[7], (1, D), jnp.float32)
    # Task-0 gate Linear(128 -> 2), zero-padded to 128 output columns
    wg_t = lin(ks[8], D, 2)
    bg_t = scale * jax.random.normal(ks[9], (1, 2), jnp.float32)
    wg_pad = jnp.zeros((D, D), jnp.float32).at[:, :2].set(wg_t)
    bg_pad = jnp.zeros((1, D), jnp.float32).at[:, :2].set(bg_t)

    # --- Packed / fused parameter layout for the kernel ---------------------
    w1_cat = jnp.concatenate([w1_s, w1_t, wg_pad], axis=1)      # (128, 384)
    b1_cat = jnp.concatenate([b1_s, b1_t, bg_pad], axis=1)      # (1, 384)
    w2_stack = jnp.concatenate([w2_s, w2_t], axis=0)            # (256, 128)
    b2_stack = jnp.concatenate([b2_s, b2_t], axis=0)            # (2, 128)

    return dict(
        # raw weights (used by the pure-JAX reference)
        w1_s=w1_s, b1_s=b1_s, w2_s=w2_s, b2_s=b2_s,
        w1_t=w1_t, b1_t=b1_t, w2_t=w2_t, b2_t=b2_t,
        wg_t=wg_t, bg_t=bg_t,
        # packed weights (used by the Pallas kernel)
        w1_cat=w1_cat, b1_cat=b1_cat, w2_stack=w2_stack, b2_stack=b2_stack)


def ple_protein_reference(ec_x, p):
    """Pure-JAX reference of the same forward (ec_x given, rpre_x=None)."""
    B = ec_x.shape[0]
    x = ec_x.reshape(B, D)
    y_s = jnp.maximum(x @ p["w1_s"] + p["b1_s"], 0.0) @ p["w2_s"] + p["b2_s"]
    y_t = jnp.maximum(x @ p["w1_t"] + p["b1_t"], 0.0) @ p["w2_t"] + p["b2_t"]
    g = x @ p["wg_t"] + p["bg_t"]                       # (B, 2), no softmax
    out = g[:, 0:1] * y_s + g[:, 1:2] * y_t
    return out.reshape(B, 1, D)


if __name__ == "__main__":
    key = jax.random.PRNGKey(0)
    k_in, k_par = jax.random.split(key)

    B = 8
    ec_x = jax.random.normal(k_in, (B, 1, D), jnp.float32)   # protein input (B, 1, 128)
    params = init_params(k_par)

    task_out = ple_protein_forward(ec_x, params)
    out0 = jax.block_until_ready(task_out[0])
    assert task_out[1] is None
    assert out0.shape == (B, 1, D)

    ref0 = ple_protein_reference(ec_x, params)
    assert jnp.allclose(out0, ref0, rtol=1e-4, atol=1e-4)

    print("KERNEL_OK")
</pallas_src>

<mosaic_0001>
module attributes {stable_mosaic.version = 11 : i64} {
  func.func @_ple_protein_kernel(%arg0: i32, %arg1: memref<8x128xf32, #tpu.memory_space<vmem>>, %arg2: memref<128x384xf32, #tpu.memory_space<vmem>>, %arg3: memref<1x384xf32, #tpu.memory_space<vmem>>, %arg4: memref<256x128xf32, #tpu.memory_space<vmem>>, %arg5: memref<2x128xf32, #tpu.memory_space<vmem>>, %arg6: memref<8x128xf32, #tpu.memory_space<vmem>>) attributes {dimension_semantics = [#tpu.dimension_semantics<parallel>], iteration_bounds = array<i64: 1>, scalar_prefetch = 0 : i64, scratch_operands = 0 : i64, tpu.core_type = #tpu.core_type<tc>, window_params = [{transform_indices = @transform_0, window_bounds = array<i64: 8, 128>}, {pipeline_mode = #tpu.pipeline_mode<synchronous>, transform_indices = @transform_1, window_bounds = array<i64: 128, 384>}, {pipeline_mode = #tpu.pipeline_mode<synchronous>, transform_indices = @transform_2, window_bounds = array<i64: 1, 384>}, {pipeline_mode = #tpu.pipeline_mode<synchronous>, transform_indices = @transform_3, window_bounds = array<i64: 256, 128>}, {pipeline_mode = #tpu.pipeline_mode<synchronous>, transform_indices = @transform_4, window_bounds = array<i64: 2, 128>}, {transform_indices = @transform_5, window_bounds = array<i64: 8, 128>}]} {
    %c0 = arith.constant 0 : index
    %c0_0 = arith.constant 0 : index
    %0 = vector.load %arg1[%c0, %c0_0] : memref<8x128xf32, #tpu.memory_space<vmem>>, vector<8x128xf32>
    %c0_1 = arith.constant 0 : index
    %c0_2 = arith.constant 0 : index
    %1 = vector.load %arg2[%c0_1, %c0_2] : memref<128x384xf32, #tpu.memory_space<vmem>>, vector<128x384xf32>
    %cst = arith.constant dense<0.000000e+00> : vector<8x384xf32>
    %2 = tpu.matmul %0, %1, %cst {dimension_numbers = #tpu.dot_dimension_numbers<[1], [0], [0], [1], [0, 0, 1, 1], [], []>} : vector<8x128xf32>, vector<128x384xf32>, vector<8x384xf32> -> vector<8x384xf32>
    %c0_3 = arith.constant 0 : index
    %c0_4 = arith.constant 0 : index
    %3 = vector.load %arg3[%c0_3, %c0_4] : memref<1x384xf32, #tpu.memory_space<vmem>>, vector<1x384xf32>
    %4 = vector.broadcast %3 : vector<1x384xf32> to vector<8x384xf32>
    %5 = arith.addf %2, %4 : vector<8x384xf32>
    %6 = vector.extract_strided_slice %5 {offsets = [0, 0], sizes = [8, 128], strides = [1, 1]} : vector<8x384xf32> to vector<8x128xf32>
    %cst_5 = arith.constant 0.000000e+00 : f32
    %7 = vector.broadcast %cst_5 : f32 to vector<8x128xf32>
    %8 = arith.maximumf %6, %7 : vector<8x128xf32>
    %9 = vector.extract_strided_slice %5 {offsets = [0, 128], sizes = [8, 128], strides = [1, 1]} : vector<8x384xf32> to vector<8x128xf32>
    %cst_6 = arith.constant 0.000000e+00 : f32
    %10 = vector.broadcast %cst_6 : f32 to vector<8x128xf32>
    %11 = arith.maximumf %9, %10 : vector<8x128xf32>
    %12 = vector.extract_strided_slice %5 {offsets = [0, 256], sizes = [8, 1], strides = [1, 1]} : vector<8x384xf32> to vector<8x1xf32>
    %13 = vector.extract_strided_slice %5 {offsets = [0, 257], sizes = [8, 1], strides = [1, 1]} : vector<8x384xf32> to vector<8x1xf32>
    %14 = vector.broadcast %12 : vector<8x1xf32> to vector<8x128xf32>
    %15 = arith.mulf %14, %8 : vector<8x128xf32>
    %16 = vector.broadcast %13 : vector<8x1xf32> to vector<8x128xf32>
    %17 = arith.mulf %16, %11 : vector<8x128xf32>
    %18 = tpu.concatenate %15, %17 in 1 : vector<8x128xf32>, vector<8x128xf32> -> vector<8x256xf32>
    %c0_7 = arith.constant 0 : index
    %c0_8 = arith.constant 0 : index
    %19 = vector.load %arg4[%c0_7, %c0_8] : memref<256x128xf32, #tpu.memory_space<vmem>>, vector<256x128xf32>
    %cst_9 = arith.constant dense<0.000000e+00> : vector<8x128xf32>
    %20 = tpu.matmul %18, %19, %cst_9 {dimension_numbers = #tpu.dot_dimension_numbers<[1], [0], [0], [1], [0, 0, 1, 1], [], []>} : vector<8x256xf32>, vector<256x128xf32>, vector<8x128xf32> -> vector<8x128xf32>
    %c0_10 = arith.constant 0 : index
    %c0_11 = arith.constant 0 : index
    %21 = vector.load %arg5[%c0_10, %c0_11] : memref<2x128xf32, #tpu.memory_space<vmem>>, vector<1x128xf32>
    %22 = vector.broadcast %12 : vector<8x1xf32> to vector<8x128xf32>
    %23 = vector.broadcast %21 : vector<1x128xf32> to vector<8x128xf32>
    %24 = arith.mulf %22, %23 : vector<8x128xf32>
    %25 = arith.addf %20, %24 : vector<8x128xf32>
    %c1 = arith.constant 1 : index
    %c0_12 = arith.constant 0 : index
    %26 = vector.load %arg5[%c1, %c0_12] : memref<2x128xf32, #tpu.memory_space<vmem>>, vector<1x128xf32>
    %27 = vector.broadcast %13 : vector<8x1xf32> to vector<8x128xf32>
    %28 = vector.broadcast %26 : vector<1x128xf32> to vector<8x128xf32>
    %29 = arith.mulf %27, %28 : vector<8x128xf32>
    %30 = arith.addf %25, %29 : vector<8x128xf32>
    %c0_13 = arith.constant 0 : index
    %c0_14 = arith.constant 0 : index
    %31 = vector.load %arg6[%c0_13, %c0_14] : memref<8x128xf32, #tpu.memory_space<vmem>>, vector<8x128xf32>
    tpu.vector_store %arg6[%c0_13, %c0_14], %30 {strides = array<i32>} : memref<8x128xf32, #tpu.memory_space<vmem>>, vector<8x128xf32>,
    return
  }
  func.func @transform_0(%arg0: i32) -> (i32, i32) {
    %c0_i32 = arith.constant 0 : i32
    %c0_i32_0 = arith.constant 0 : i32
    return %arg0, %c0_i32 : i32, i32
  }
  func.func @transform_1(%arg0: i32) -> (i32, i32) {
    %c0_i32 = arith.constant 0 : i32
    %c0_i32_0 = arith.constant 0 : i32
    %c0_i32_1 = arith.constant 0 : i32
    return %c0_i32, %c0_i32_0 : i32, i32
  }
  func.func @transform_2(%arg0: i32) -> (i32, i32) {
    %c0_i32 = arith.constant 0 : i32
    %c0_i32_0 = arith.constant 0 : i32
    %c0_i32_1 = arith.constant 0 : i32
    return %c0_i32, %c0_i32_0 : i32, i32
  }
  func.func @transform_3(%arg0: i32) -> (i32, i32) {
    %c0_i32 = arith.constant 0 : i32
    %c0_i32_0 = arith.constant 0 : i32
    %c0_i32_1 = arith.constant 0 : i32
    return %c0_i32, %c0_i32_0 : i32, i32
  }
  func.func @transform_4(%arg0: i32) -> (i32, i32) {
    %c0_i32 = arith.constant 0 : i32
    %c0_i32_0 = arith.constant 0 : i32
    %c0_i32_1 = arith.constant 0 : i32
    return %c0_i32, %c0_i32_0 : i32, i32
  }
  func.func @transform_5(%arg0: i32) -> (i32, i32) {
    %c0_i32 = arith.constant 0 : i32
    %c0_i32_0 = arith.constant 0 : i32
    return %arg0, %c0_i32 : i32, i32
  }
}

</mosaic_0001>

<bundles_post_ra>
// kernel: tpu_custom_call.1
= control target key start
LH: loop header
LB: loop body
LE: loop exit
PB: predicated region body
PF: predicated region fallthrough
CT: control target
= control target key end

     0   :  { %10 = vsyncpa [#allocation3], 0  ;;  %s809_s0 = inlined_call_operand.hbm [shape: f32[8,128], index: 0, kind: input, shape index: {}]   ;;  %s810_s1 = inlined_call_operand.hbm [shape: f32[128,384], index: 1, kind: input, shape index: {}]   ;;  %s811_s2 = inlined_call_operand.vmem [shape: f32[1,384], index: 2, kind: input, shape index: {}]   ;;  %s812_s3 = inlined_call_operand.hbm [shape: f32[256,128], index: 3, kind: input, shape index: {}]   ;;  %s813_s4 = inlined_call_operand.vmem [shape: f32[2,128], index: 4, kind: input, shape index: {}]   ;;  %s814_s5 = inlined_call_operand.hbm [shape: f32[8,128], index: 5, kind: output, shape index: {}]  }
   0x1   :  { %11 = vsyncpa [#allocation6], 0 }
   0x2   :  { %12 = vsyncpa [#allocation4], 0  ;;  %s699_s18 = smov [#allocation5]   ;;  %s605_s22 = scalar_lea.hbm %s810_s1, 6144 }
   0x3   :  { %s28_s19 = sshll.u32 %s699_s18, 4  ;;  %p606_p0 = scmp.ne.s32.totalorder %s810_s1, %s605_s22  ;;  %s29_s19 = int_to_ptr.vmem [resolvable:$true] %s28_s19 }
   0x4   :  { %p609_p1 = scmp.lt.u32.totalorder %s605_s22, %s810_s1 }
   0x6   :  { %p611_p2 = pnand %p609_p1, %p606_p0 }
   0x8   :  { %614 = shalt.err (!%p611_p2)
}
   0x9   :  { %s615_s27 = scalar_lea.vmem %s29_s19, 6144  ;;  %p620_p4 = scmp.lt.s32.totalorder %s29_s19, %s29_s19 }
   0xa   :  { %p616_p3 = scmp.ne.s32.totalorder %s29_s19, %s615_s27  ;;  %p621_p5 = scmp.lt.s32.totalorder %s615_s27, %s615_s27 }
   0xc   :  { %p622_p6 = por %p621_p5, %p620_p4 }
   0xe   :  { %p623_p7 = pnand %p622_p6, %p616_p3 }
  0x10   :  { %626 = shalt.err (!%p623_p7)
}
  0x11   :  { %s700_s28 = smov 384   ;;  %s701_s29 = smov 24  }
  0x12   :  { %34 = dma.hbm_to_vmem [thread:$0]  %s810_s1, 6144, %s29_s19, [#allocation6], %s700_s28, %s700_s28, %s701_s29  }
  0x13   :  { %s702_s7 = smov [#allocation2]   ;;  %s703_s9 = smov [#allocation7]  }
  0x14   :  { %s19_s8 = sshll.u32 %s702_s7, 4  ;;  %s42_s10 = sshll.u32 %s703_s9, 4  ;;  %s20_s8 = int_to_ptr.vmem [resolvable:$true] %s19_s8  ;;  %s43_s10 = int_to_ptr.vmem [resolvable:$true] %s42_s10 }
  0x15   :  { %s627_s13 = scalar_lea.hbm %s809_s0, 128 }
  0x16   :  { %p628_p8 = scmp.ne.s32.totalorder %s809_s0, %s627_s13  ;;  %p631_p9 = scmp.lt.u32.totalorder %s627_s13, %s809_s0 }
  0x18   :  { %p633_p10 = pnand %p631_p9, %p628_p8 }
  0x1a   :  { %636 = shalt.err (!%p633_p10)
}
  0x1b   :  { %s637_s1 = scalar_lea.vmem %s20_s8, 128  ;;  %p642_p12 = scmp.lt.s32.totalorder %s20_s8, %s20_s8 }
  0x1c   :  { %p638_p11 = scmp.ne.s32.totalorder %s20_s8, %s637_s1  ;;  %p643_p13 = scmp.lt.s32.totalorder %s637_s1, %s637_s1 }
  0x1e   :  { %p644_p0 = por %p643_p13, %p642_p12 }
  0x20   :  { %p645_p1 = pnand %p644_p0, %p638_p11 }
  0x22   :  { %648 = shalt.err (!%p645_p1)
}
  0x23   :  { %22 = dma.hbm_to_vmem [thread:$0]  %s809_s0, 128, %s20_s8, [#allocation3]  }
  0x24   :  { %s649_s22 = scalar_lea.hbm %s812_s3, 4096 }
  0x25   :  { %p650_p2 = scmp.ne.s32.totalorder %s812_s3, %s649_s22  ;;  %p653_p3 = scmp.lt.u32.totalorder %s649_s22, %s812_s3 }
  0x27   :  { %p655_p4 = pnand %p653_p3, %p650_p2 }
  0x29   :  { %658 = shalt.err (!%p655_p4)
}
  0x2a   :  { %s659_s27 = scalar_lea.vmem %s43_s10, 4096  ;;  %p664_p6 = scmp.lt.s32.totalorder %s43_s10, %s43_s10 }
  0x2b   :  { %p660_p5 = scmp.ne.s32.totalorder %s43_s10, %s659_s27  ;;  %p665_p7 = scmp.lt.s32.totalorder %s659_s27, %s659_s27 }
  0x2d   :  { %p666_p8 = por %p665_p7, %p664_p6 }
  0x2f   :  { %p667_p9 = pnand %p666_p8, %p660_p5 }
  0x31   :  { %670 = shalt.err (!%p667_p9)
}
  0x32   :  { %s704_s0 = smov 128   ;;  %s705_s28 = smov 8  }
  0x33   :  { %48 = dma.hbm_to_vmem [thread:$0]  %s812_s3, 4096, %s43_s10, [#allocation6], %s704_s0, %s704_s0, %s705_s28  }
  0x34   :  { %693 = dma.done.wait [#allocation3], 128  }
  0x35   :  { %694 = vsyncadd [#allocation3], 4294967168 }
  0x36   :  { %695 = dma.done.wait [#allocation6], 10240  }
  0x37   :  { %696 = vsyncadd [#allocation6], 4294957056  ;;  %v706_v0 = vmov 0.0|0.0   ;;  %vm707_vm0 = vmmov 0   ;;  %v708_v1 = vmov 0.0   ;;  %v63_v2 = vld [vmem:[#allocation5 + $0x10] sm:$0xff] }
  0x38   :  { %533 = vmatprep.subr.bf16.mxu1 %v706_v0  ;;  %498 = vmatprep.mubr.msk.f32.mxu1 %vm707_vm0, %v708_v1  ;;  %v66_v3 = vld [vmem:[#allocation5 + $0x28] sm:$0xff]  ;;  %v69_v4 = vld [vmem:[#allocation5 + $0x40] sm:$0xff]  ;;  %v72_v6 = vld [vmem:[#allocation5 + $0x58] sm:$0xff]  ;;  %s711_s10 = smov [#allocation8]  }
  0x39   :  { %190 = vmatprep.mubr.f32.mxu0 %v708_v1  ;;  %v534_v5 = vpack.c.bf16 %v66_v3, %v63_v2  ;;  %v537_v7 = vpack.c.bf16 %v72_v6, %v69_v4  ;;  %v75_v8 = vld [vmem:[#allocation5 + $0x70] sm:$0xff]  ;;  %v78_v9 = vld [vmem:[#allocation5 + $0x88] sm:$0xff]  ;;  %v81_v11 = vld [vmem:[#allocation5 + $0xa0] sm:$0xff]  ;;  %s402_s11 = sshll.u32 %s711_s10, 4  ;;  %s403_s11 = int_to_ptr.vmem [resolvable:$true] %s402_s11 }
  0x3a   :  { %v62_v10 = vld [vmem:[#allocation5 + $0x8] sm:$0xff]  ;;  %v84_v12 = vld [vmem:[#allocation5 + $0xb8] sm:$0xff]  ;;  %v65_v13 = vld [vmem:[#allocation5 + $0x20] sm:$0xff]  ;;  %v540_v16 = vpack.c.bf16 %v78_v9, %v75_v8  ;;  %s671_s12 = scalar_lea.vmem %s403_s11, 128  ;;  %p676_p11 = scmp.lt.s32.totalorder %s403_s11, %s403_s11 }
  0x3b   :  { %535 = vmatpush3.bf16.msra.mxu1 %v534_v5  ;;  %v61_v14 = vld [vmem:[#allocation5] sm:$0xff]  ;;  %v64_v15 = vld [vmem:[#allocation5 + $0x18] sm:$0xff]  ;;  %v501_v17 = vpack.c.bf16 %v65_v13, %v62_v10  ;;  %v71_v20 = vld [vmem:[#allocation5 + $0x50] sm:$0xff]  ;;  %v543_v27 = vpack.c.bf16 %v84_v12, %v81_v11  ;;  %v709_v12 = vmov 1   ;;  %p672_p10 = scmp.ne.s32.totalorder %s403_s11, %s671_s12  ;;  %p677_p12 = scmp.lt.s32.totalorder %s671_s12, %s671_s12 }
  0x3c   :  { %536 = vmatprep.subr.bf16.mxu1 %v706_v0  ;;  %v503_v18 = vpack.c.bf16 %v64_v15, %v61_v14  ;;  %v68_v19 = vld [vmem:[#allocation5 + $0x38] sm:$0xff]  ;;  %v67_v21 = vld [vmem:[#allocation5 + $0x30] sm:$0xff]  ;;  %v70_v23 = vld [vmem:[#allocation5 + $0x48] sm:$0xff]  ;;  %602 = vset.pattern.permute.xlu0 %v709_v12 }
  0x3d   :  { %v505_v22 = vpack.c.bf16 %v71_v20, %v68_v19  ;;  %v74_v24 = vld [vmem:[#allocation5 + $0x68] sm:$0xff]  ;;  %v77_v25 = vld [vmem:[#allocation5 + $0x80] sm:$0xff]  ;;  %502 = vmatprep.subr.bf16.mxu0 %v501_v17  ;;  %v507_v26 = vpack.c.bf16 %v70_v23, %v67_v21  ;;  %v87_v28 = vld [vmem:[#allocation5 + $0xd0] sm:$0xff]  ;;  %p678_p13 = por %p677_p12, %p676_p11 }
  0x3e   :  { %504 = vmatpush1.bf16.msra.mxu0 %v503_v18  ;;  %v509_v29 = vpack.c.bf16 %v77_v25, %v74_v24  ;;  %v73_v30 = vld [vmem:[#allocation5 + $0x60] sm:$0xff]  ;;  %v76_v31 = vld [vmem:[#allocation5 + $0x78] sm:$0xff]  ;;  %v90_v32 = vld [vmem:[#allocation5 + $0xe8] sm:$0xff] }
  0x3f   :  { %538 = vmatpush3.bf16.msra.mxu1 %v537_v7  ;;  %506 = vmatprep.subr.bf16.mxu0 %v505_v22  ;;  %v80_v33 = vld [vmem:[#allocation5 + $0x98] sm:$0xff]  ;;  %v83_v34 = vld [vmem:[#allocation5 + $0xb0] sm:$0xff]  ;;  %v511_v35 = vpack.c.bf16 %v76_v31, %v73_v30  ;;  %v546_v36 = vpack.c.bf16 %v90_v32, %v87_v28  ;;  %v93_v37 = vld [vmem:[#allocation5 + $0x100] sm:$0xff]  ;;  %p679_p0 = pnand %p678_p13, %p672_p10 }
  0x40   :  { %539 = vmatprep.subr.bf16.mxu1 %v706_v0  ;;  %v513_v38 = vpack.c.bf16 %v83_v34, %v80_v33  ;;  %v79_v39 = vld [vmem:[#allocation5 + $0x90] sm:$0xff]  ;;  %v82_v40 = vld [vmem:[#allocation5 + $0xa8] sm:$0xff]  ;;  %v96_v41 = vld [vmem:[#allocation5 + $0x118] sm:$0xff] }
  0x41   :  { %v86_v42 = vld [vmem:[#allocation5 + $0xc8] sm:$0xff]  ;;  %v89_v43 = vld [vmem:[#allocation5 + $0xe0] sm:$0xff]  ;;  %v515_v44 = vpack.c.bf16 %v82_v40, %v79_v39  ;;  %v549_v45 = vpack.c.bf16 %v96_v41, %v93_v37  ;;  %v99_v46 = vld [vmem:[#allocation5 + $0x130] sm:$0xff] }
  0x42   :  { %508 = vmatpush1.bf16.msra.mxu0 %v507_v26  ;;  %v517_v47 = vpack.c.bf16 %v89_v43, %v86_v42  ;;  %v85_v48 = vld [vmem:[#allocation5 + $0xc0] sm:$0xff]  ;;  %v88_v49 = vld [vmem:[#allocation5 + $0xd8] sm:$0xff]  ;;  %v102_v50 = vld [vmem:[#allocation5 + $0x148] sm:$0xff] }
  0x43   :  { %541 = vmatpush3.bf16.msra.mxu1 %v540_v16  ;;  %510 = vmatprep.subr.bf16.mxu0 %v509_v29  ;;  %v92_v51 = vld [vmem:[#allocation5 + $0xf8] sm:$0xff]  ;;  %v95_v52 = vld [vmem:[#allocation5 + $0x110] sm:$0xff]  ;;  %v519_v53 = vpack.c.bf16 %v88_v49, %v85_v48  ;;  %v552_v54 = vpack.c.bf16 %v102_v50, %v99_v46  ;;  %v105_v55 = vld [vmem:[#allocation5 + $0x160] sm:$0xff]  ;;  %v111_v48 = vlaneseq }
  0x44   :  { %542 = vmatprep.subr.bf16.mxu1 %v706_v0  ;;  %v521_v56 = vpack.c.bf16 %v95_v52, %v92_v51  ;;  %v91_v57 = vld [vmem:[#allocation5 + $0xf0] sm:$0xff]  ;;  %v94_v58 = vld [vmem:[#allocation5 + $0x108] sm:$0xff]  ;;  %v108_v59 = vld [vmem:[#allocation5 + $0x178] sm:$0xff] }
  0x45   :  { %v98_v60 = vld [vmem:[#allocation5 + $0x128] sm:$0xff]  ;;  %v101_v61 = vld [vmem:[#allocation5 + $0x140] sm:$0xff]  ;;  %v523_v62 = vpack.c.bf16 %v94_v58, %v91_v57  ;;  %v555_v63 = vpack.c.bf16 %v108_v59, %v105_v55  ;;  %v100_v3 = vld [vmem:[#allocation5 + $0x138] sm:$0xff]  ;;  %v112_v49 = vshrl.u32 %v111_v48, 7 }
  0x46   :  { %512 = vmatpush1.bf16.msra.mxu0 %v511_v35  ;;  %v525_v1 = vpack.c.bf16 %v101_v61, %v98_v60  ;;  %v97_v2 = vld [vmem:[#allocation5 + $0x120] sm:$0xff]  ;;  %v104_v4 = vld [vmem:[#allocation5 + $0x158] sm:$0xff]  ;;  %v107_v5 = vld [vmem:[#allocation5 + $0x170] sm:$0xff] }
  0x47   :  { %544 = vmatpush3.bf16.msra.mxu1 %v543_v27  ;;  %514 = vmatprep.subr.bf16.mxu0 %v513_v38  ;;  %v527_v6 = vpack.c.bf16 %v100_v3, %v97_v2  ;;  %v60_v7 = vld [vmem:[#allocation2] sm:$0xff]  ;;  %v529_v8 = vpack.c.bf16 %v107_v5, %v104_v4  ;;  %v103_v9 = vld [vmem:[#allocation5 + $0x150] sm:$0xff]  ;;  %v106_v10 = vld [vmem:[#allocation5 + $0x168] sm:$0xff]  ;;  %v121_v50 = vsub.s32 2, %v112_v49  ;;  %v710_v5 = vmov 0  }
  0x48   :  { %545 = vmatprep.subr.bf16.mxu1 %v706_v0  ;;  %v531_v11 = vpack.c.bf16 %v106_v10, %v103_v9  ;;  %v297_v13 = vld [vmem:[#allocation7 + $0x88] sm:$0xff]  ;;  %v280_v14 = vld [vmem:[#allocation7] sm:$0xff]  ;;  %v298_v17 = vld [vmem:[#allocation7 + $0x90] sm:$0xff]  ;;  %v113_v10 = vsub.s32 0, %v112_v49 }
  0x49   :  { %v281_v16 = vld [vmem:[#allocation7 + $0x8] sm:$0xff]  ;;  %v299_v18 = vld [vmem:[#allocation7 + $0x98] sm:$0xff]  ;;  %v282_v21 = vld [vmem:[#allocation7 + $0x10] sm:$0xff] }
  0x4a   :  { %516 = vmatpush1.bf16.msra.mxu0 %v515_v44  ;;  %v559_v19 = vpack.c.bf16 %v281_v16, %v280_v14  ;;  %v561_v20 = vpack.c.bf16 %v299_v18, %v298_v17  ;;  %v283_v22 = vld [vmem:[#allocation7 + $0x18] sm:$0xff]  ;;  %v300_v23 = vld [vmem:[#allocation7 + $0xa0] sm:$0xff]  ;;  %v301_v24 = vld [vmem:[#allocation7 + $0xa8] sm:$0xff] }
  0x4b   :  { %547 = vmatpush3.bf16.msra.mxu1 %v546_v36  ;;  %518 = vmatprep.subr.bf16.mxu0 %v517_v47  ;;  %v563_v25 = vpack.c.bf16 %v283_v22, %v282_v21  ;;  %v565_v26 = vpack.c.bf16 %v301_v24, %v300_v23  ;;  %v284_v27 = vld [vmem:[#allocation7 + $0x20] sm:$0xff]  ;;  %v285_v28 = vld [vmem:[#allocation7 + $0x28] sm:$0xff]  ;;  %v302_v29 = vld [vmem:[#allocation7 + $0xb0] sm:$0xff] }
  0x4c   :  { %548 = vmatprep.subr.bf16.mxu1 %v706_v0  ;;  %v303_v30 = vld [vmem:[#allocation7 + $0xb8] sm:$0xff]  ;;  %v567_v31 = vpack.c.bf16 %v285_v28, %v284_v27  ;;  %v286_v33 = vld [vmem:[#allocation7 + $0x30] sm:$0xff]  ;;  %v304_v35 = vld [vmem:[#allocation7 + $0xc0] sm:$0xff] }
  0x4d   :  { %v569_v32 = vpack.c.bf16 %v303_v30, %v302_v29  ;;  %v287_v34 = vld [vmem:[#allocation7 + $0x38] sm:$0xff]  ;;  %v305_v36 = vld [vmem:[#allocation7 + $0xc8] sm:$0xff]  ;;  %v288_v39 = vld [vmem:[#allocation7 + $0x40] sm:$0xff] }
  0x4e   :  { %520 = vmatpush1.bf16.msra.mxu0 %v519_v53  ;;  %v571_v37 = vpack.c.bf16 %v287_v34, %v286_v33  ;;  %v573_v38 = vpack.c.bf16 %v305_v36, %v304_v35  ;;  %v289_v40 = vld [vmem:[#allocation7 + $0x48] sm:$0xff]  ;;  %v306_v41 = vld [vmem:[#allocation7 + $0xd0] sm:$0xff]  ;;  %v307_v42 = vld [vmem:[#allocation7 + $0xd8] sm:$0xff] }
  0x4f   :  { %550 = vmatpush3.bf16.msra.mxu1 %v549_v45  ;;  %522 = vmatprep.subr.bf16.mxu0 %v521_v56  ;;  %v575_v43 = vpack.c.bf16 %v289_v40, %v288_v39  ;;  %v577_v44 = vpack.c.bf16 %v307_v42, %v306_v41  ;;  %v290_v45 = vld [vmem:[#allocation7 + $0x50] sm:$0xff]  ;;  %v291_v46 = vld [vmem:[#allocation7 + $0x58] sm:$0xff]  ;;  %v308_v53 = vld [vmem:[#allocation7 + $0xe0] sm:$0xff] }
  0x50   :  { %551 = vmatprep.subr.bf16.mxu1 %v706_v0  ;;  %v579_v47 = vpack.c.bf16 %v291_v46, %v290_v45  ;;  %v109_v51 = vld [vmem:[%s811_s2] sm:$0x7]  ;;  %v292_v57 = vld [vmem:[#allocation7 + $0x60] sm:$0xff]  ;;  %v293_v58 = vld [vmem:[#allocation7 + $0x68] sm:$0xff] }
  0x51   :  { %v122_v52 = vrot.slane %v109_v51, %v121_v50  ;;  %v583_v61 = vpack.c.bf16 %v293_v58, %v292_v57  ;;  %v294_v2 = vld [vmem:[#allocation7 + $0x70] sm:$0xff]  ;;  %v295_v3 = vld [vmem:[#allocation7 + $0x78] sm:$0xff] }
  0x52   :  { %524 = vmatpush1.bf16.msra.mxu0 %v523_v62  ;;  %v310_v62 = vld [vmem:[#allocation7 + $0xf0] sm:$0xff]  ;;  %v587_v4 = vpack.c.bf16 %v295_v3, %v294_v2 }
  0x53   :  { %553 = vmatpush3.bf16.msra.mxu1 %v552_v54  ;;  %526 = vmatprep.subr.bf16.mxu0 %v525_v1  ;;  %v309_v54 = vld [vmem:[#allocation7 + $0xe8] sm:$0xff] }
  0x54   :  { %554 = vmatprep.subr.bf16.mxu1 %v706_v0  ;;  %v296_v0 = vld [vmem:[#allocation7 + $0x80] sm:$0xff]  ;;  %v581_v56 = vpack.c.bf16 %v309_v54, %v308_v53 }
  0x55   :  { %v557_v15 = vpack.c.bf16 %v297_v13, %v296_v0  ;;  %v114_v0 = vrot.slane %v109_v51, %v113_v10 }
  0x56   :  { %528 = vmatpush1.bf16.msra.mxu0 %v527_v6 }
  0x57   :  { %556 = vmatpush3.bf16.msra.mxu1 %v555_v63  ;;  %530 = vmatprep.subr.bf16.mxu0 %v529_v8  ;;  %v311_v63 = vld [vmem:[#allocation7 + $0xf8] sm:$0xff]  ;;  %v117_v8 = vsub.s32 1, %v112_v49 }
  0x58   :  { %v585_v1 = vpack.c.bf16 %v311_v63, %v310_v62 }
  0x59   :  { %v118_v9 = vrot.slane %v109_v51, %v117_v8 }
  0x5a   :  { %499 = vmatmul.mubr.f32.vlgmr.msra.gmra.mrb[0].mxu1 %v60_v7  ;;  %532 = vmatpush1.bf16.msra.mxu0 %v531_v11 }
  0x5b   :  { %558 = vmatprep.subr.bf16.mxu0 %v557_v15 }
  0x5d   :  { %191 = vmatmul.mubr.f32.vlgmr.msra.gmra.mrb[0].mxu0 %v60_v7 }
  0x5e   :  { %560 = vmatpush3.bf16.msra.mxu0 %v559_v19 }
  0x5f   :  { %562 = vmatprep.subr.bf16.mxu0 %v561_v20  ;;  %v412_v20 = vld [vmem:[%s813_s4] ss:$0 sm:$0xff] }
  0x62   :  { %564 = vmatpush3.bf16.msra.mxu0 %v563_v25 }
  0x63   :  { %566 = vmatprep.subr.bf16.mxu0 %v565_v26 }
  0x66   :  { %568 = vmatpush3.bf16.msra.mxu0 %v567_v31 }
  0x67   :  { %570 = vmatprep.subr.bf16.mxu0 %v569_v32 }
  0x6a   :  { %572 = vmatpush3.bf16.msra.mxu0 %v571_v37 }
  0x6b   :  { %574 = vmatprep.subr.bf16.mxu0 %v573_v38 }
  0x6e   :  { %576 = vmatpush3.bf16.msra.mxu0 %v575_v43 }
  0x6f   :  { %578 = vmatprep.subr.bf16.mxu0 %v577_v44 }
  0x72   :  { %580 = vmatpush3.bf16.msra.mxu0 %v579_v47 }
  0x73   :  { %582 = vmatprep.subr.bf16.mxu0 %v581_v56 }
  0x76   :  { %584 = vmatpush3.bf16.msra.mxu0 %v583_v61 }
  0x77   :  { %586 = vmatprep.subr.bf16.mxu0 %v585_v1 }
  0x7a   :  { %588 = vmatpush3.bf16.msra.mxu0 %v587_v4 }
 0x12d   :  { %v263_v55 = vpop.f32.mrb[0].mxu1 }
 0x12e   :  { %v264_v59 = vadd.f32 %v263_v55, %v122_v52  ;;  %v500_v60 = vpop.f32.mrb[1].mxu1 }
 0x130   :  { %276 = vperm.xlu0 %602, %v264_v59   ;;  %v192_v6 = vpop.f32.mrb[0].mxu0 }
 0x131   :  { %v194_v7 = vpop.f32.mrb[1].mxu0  ;;  %v193_v14 = vadd.f32 %v192_v6, %v114_v0 }
 0x132   :  { %v195_v11 = vadd.f32 %v194_v7, %v118_v9 }
 0x133   :  { %v267_v17 = vmax.f32 %v193_v14, 0.0 }
 0x134   :  { %603 = vset.pattern.permute.xlu0 %v710_v5  ;;  %v268_v13 = vmax.f32 %v195_v11, 0.0 }
 0x135   :  { %271 = vperm.xlu0 %603, %v264_v59  }
 0x139   :  { %604 = vset.pattern.permute.xlu0 %v709_v12  ;;  %v413_v12 = vld [vmem:[%s813_s4 + $0x1] ss:$0 sm:$0xff] }
 0x1af   :  { %v277_v15 = vpop.permute.xlu0 %276 }
 0x1b0   :  { %v279_v16 = vmul.f32 %v277_v15, %v268_v13  ;;  %v393_v25 = vmul.f32 %v413_v12, %v277_v15 }
 0x1b2   :  { %382 = vmatprep.mubr.f32.mxu0 %v279_v16 }
 0x1b4   :  { %v272_v18 = vpop.permute.xlu0 %271 }
 0x1b5   :  { %v274_v19 = vmul.f32 %v272_v18, %v267_v17  ;;  %v317_v23 = vmul.f32 %v412_v20, %v272_v18 }
 0x1b7   :  { %383 = vmatmul.mubr.f32.vlgmr.msra.gmra.mrb[2].mxu0 %v274_v19 }
 0x28a   :  { %v463_v21 = vpop.f32.mrb[2].mxu0 }
 0x28b   :  { %v464_v22 = vpop.f32.mrb[3].mxu0 }
 0x28c   :  { %v465_v24 = vadd.f32 %v464_v22, %v463_v21 }
 0x28e   :  { %v385_v26 = vadd.f32 %v465_v24, %v317_v23 }
 0x290   :  { %v394_v27 = vadd.f32 %v393_v25, %v385_v26 }
 0x292   :  { %395 = vst [vmem:[#allocation8] sm:$0xff] %v394_v27 }
 0x293   :  { %682 = shalt.err (!%p679_p0)
}
 0x294   :  { %s683_s4 = scalar_lea.hbm %s814_s5, 128 }
 0x295   :  { %p684_p1 = scmp.ne.s32.totalorder %s814_s5, %s683_s4  ;;  %p687_p2 = scmp.lt.u32.totalorder %s683_s4, %s814_s5 }
 0x297   :  { %p689_p3 = pnand %p687_p2, %p684_p1 }
 0x299   :  { %692 = shalt.err (!%p689_p3)
}
 0x29a   :  { %405 = dma.vmem_to_hbm [thread:$0]  %s403_s11, 128, %s814_s5, [#allocation4]  }
 0x29b   :  { %697 = dma.done.wait [#allocation4], 128  }
 0x29c   :  { %698 = vsyncadd [#allocation4], 4294967168 }
 0x29d   :  { %409 = vsyncpa [#allocation3], 1 }
 0x29e   :  { %410 = vsyncpa [#allocation6], 1 }
 0x29f   :  { %411 = vsyncpa [#allocation4], 1 }

</bundles_post_ra>
